<compile_context>
chip_gen: v5e
topology: v5e:2x2
jax: 0.10.0
libtpu: 0.0.40
codegen_flags: <defaults>
</compile_context>

<pallas_src>
import jax
import jax.numpy as jnp
from jax.experimental import pallas as pl
from jax.experimental.pallas import tpu as pltpu


def _round_up(x: int, m: int) -> int:
    return ((x + m - 1) // m) * m


def _tag_embedding_kernel(x_ref, emb_ref, out_ref):
    # x_ref:   (tile_m, K) tile of the flattened (batch*seq) rows, original dtype
    # emb_ref: (K, tile_e) tile of the embedding matrix, f32
    # out_ref: (tile_m, tile_e)
    x = x_ref[...].astype(jnp.float32)
    out_ref[...] = jnp.dot(
        x, emb_ref[...], preferred_element_type=jnp.float32
    ).astype(out_ref.dtype)


# VMEM budgets (bytes). 24 MiB of pipeline buffers fits all generations once
# the scoped limit is raised (v5e default scoped VMEM 16 MiB, v6e/v7x 32 MiB;
# v7x physical VMEM per TC is 64 MiB).
_VMEM_BUDGET = 24 * 1024 * 1024
_EMB_PIN_LIMIT = 8 * 1024 * 1024  # max bytes for 2 buffered copies of the weight


def tag_embedding_forward(src, embedding, *, tile_m: int = 1024, out_dtype=None):
    """Pallas implementation of TagEmbedding.forward.

    src:       (seq, batch, input_dim)   any real/int dtype (cast to f32 in-kernel)
    embedding: (input_dim, emb_dim)      float32 parameter
    returns:   (batch, seq, emb_dim)     float32 (or `out_dtype`, e.g. bfloat16)
    """
    S, B, K = src.shape
    K2, E = embedding.shape
    assert K == K2, f"input_dim mismatch: src {K} vs embedding {K2}"
    out_dtype = jnp.float32 if out_dtype is None else out_dtype

    if src.dtype == jnp.bool_:
        src = src.astype(jnp.int32)
    emb = embedding.astype(jnp.float32)

    # permute(1,0,2) + flatten the per-batch mms into one (B*S, K) GEMM.
    # Kept in the original narrow dtype: ~K*itemsize bytes/row of input vs
    # ~E*4 bytes/row of output, so this is the cheap side of the HBM traffic.
    M = B * S
    x2d = jnp.transpose(src, (1, 0, 2)).reshape(M, K)
    in_item = jnp.dtype(x2d.dtype).itemsize
    out_item = jnp.dtype(out_dtype).itemsize

    # ---- E tiling: only if pinning the whole weight would blow the budget
    # (never triggers for this module's K=label_len, E=200; matters on v7x). ----
    e_lanes = _round_up(E, 128)  # lane-padded VMEM footprint of the weight
    if 2 * K * e_lanes * 4 <= _EMB_PIN_LIMIT:
        tile_e, grid_e = E, 1                    # full width, weight pinned
    else:
        tile_e = max(128, (_EMB_PIN_LIMIT // (2 * K * 4)) // 128 * 128)
        grid_e = pl.cdiv(E, tile_e)              # partial last block is masked

    # ---- M tiling: biggest row tile that fits the VMEM budget. ----
    te_lanes = _round_up(tile_e, 128)
    emb_buf = 2 * K * te_lanes * 4                       # worst case (double-buffered)
    per_row = 2 * (K * in_item + te_lanes * out_item)    # in + out, double-buffered
    max_tm = max(8, ((_VMEM_BUDGET - emb_buf) // per_row) // 8 * 8)
    tile_m = min(tile_m, max_tm)
    if M <= tile_m:
        tile_m, grid_m = M, 1                    # single block (full-dim is legal)
    else:
        tile_m = max(8, (tile_m // 8) * 8)
        # Prefer a tile that divides M (no partial boundary block), but never
        # shrink below half the target tile.
        for tm in range(tile_m, max(7, tile_m // 2 - 1), -8):
            if M % tm == 0:
                tile_m = tm
                break
        grid_m = pl.cdiv(M, tile_m)

    vmem_need = emb_buf + 2 * tile_m * (K * in_item + te_lanes * out_item)
    vmem_limit = None
    if vmem_need > 14 * 1024 * 1024:             # past v5e's default scoped VMEM
        vmem_limit = int(min(vmem_need + 4 * 1024 * 1024, 48 * 1024 * 1024))

    cost = pl.CostEstimate(
        flops=2 * M * K * E,
        transcendentals=0,
        bytes_accessed=M * K * in_item + K * E * 4 + M * E * out_item,
    )

    x_spec = pl.BlockSpec((tile_m, K), lambda i, j: (i, 0))
    out_spec = pl.BlockSpec((tile_m, tile_e), lambda i, j: (i, j))
    emb_map = lambda i, j: (0, j)

    def call(emb_spec):
        return pl.pallas_call(
            _tag_embedding_kernel,
            out_shape=jax.ShapeDtypeStruct((M, E), out_dtype),
            grid=(grid_m, grid_e),
            in_specs=[x_spec, emb_spec],
            out_specs=out_spec,
            compiler_params=pltpu.CompilerParams(
                dimension_semantics=("parallel", "parallel"),
                vmem_limit_bytes=vmem_limit,
            ),
            cost_estimate=cost,
        )(x2d, emb)

    if grid_e == 1:
        # Constant block index -> the weight is DMA'd only once; request a
        # single buffer so the second copy's VMEM can go to tile_m instead.
        try:
            out = call(
                pl.BlockSpec((K, tile_e), emb_map, pipeline_mode=pl.Buffered(1))
            )
        except Exception:
            # pipeline_mode unsupported on this Pallas version: default
            # double-buffering only costs 2*K*E*4 bytes (already budgeted).
            out = call(pl.BlockSpec((K, tile_e), emb_map))
    else:
        out = call(pl.BlockSpec((K, tile_e), emb_map))

    # (B*S, E) -> (B, S, E) is a pure metadata reshape (row-major), no HBM pass.
    return out.reshape(B, S, E)


if __name__ == "__main__":
    # Small shapes consistent with the module: seq=8, batch=2,
    # input_dim (label length)=16, emb_dim (char embedding)=200.
    SEQ, BATCH, INPUT_DIM, EMB_DIM = 8, 2, 16, 200

    root = jax.random.PRNGKey(0)
    k_src, k_emb = jax.random.split(root)

    # src is typically a (multi-)hot label tensor -> int; cast happens in-kernel.
    src = jax.random.bernoulli(k_src, 0.3, (SEQ, BATCH, INPUT_DIM)).astype(jnp.int32)
    # self.embedding = nn.Parameter(torch.rand(input_dim, emb_dim))
    embedding = jax.random.uniform(k_emb, (INPUT_DIM, EMB_DIM), jnp.float32)

    out = tag_embedding_forward(src, embedding)
    out = jax.block_until_ready(out)

    # Pure-JAX reference of the PyTorch forward.
    ref = jnp.einsum(
        "bsk,ke->bse",
        jnp.transpose(src, (1, 0, 2)).astype(jnp.float32),
        embedding,
    )

    assert out.shape == (BATCH, SEQ, EMB_DIM), out.shape
    assert out.dtype == jnp.float32, out.dtype
    assert bool(jnp.allclose(out, ref, atol=1e-5, rtol=1e-5))

    print("KERNEL_OK")
</pallas_src>

<mosaic_0001>
module attributes {stable_mosaic.version = 11 : i64} {
  func.func @_tag_embedding_kernel(%arg0: i32, %arg1: i32, %arg2: memref<16x16xi32, #tpu.memory_space<vmem>>, %arg3: memref<16x200xf32, #tpu.memory_space<vmem>>, %arg4: memref<16x200xf32, #tpu.memory_space<vmem>>) attributes {dimension_semantics = [#tpu.dimension_semantics<parallel>, #tpu.dimension_semantics<parallel>], iteration_bounds = array<i64: 1, 1>, scalar_prefetch = 0 : i64, scratch_operands = 0 : i64, tpu.core_type = #tpu.core_type<tc>, window_params = [{transform_indices = @transform_0, window_bounds = array<i64: 16, 16>}, {pipeline_mode = #tpu.pipeline_mode<synchronous>, transform_indices = @transform_1, window_bounds = array<i64: 16, 200>}, {transform_indices = @transform_2, window_bounds = array<i64: 16, 200>}]} {
    %c0 = arith.constant 0 : index
    %c0_0 = arith.constant 0 : index
    %0 = vector.load %arg2[%c0, %c0_0] : memref<16x16xi32, #tpu.memory_space<vmem>>, vector<16x16xi32>
    %1 = arith.sitofp %0 : vector<16x16xi32> to vector<16x16xf32>
    %c0_1 = arith.constant 0 : index
    %c0_2 = arith.constant 0 : index
    %2 = vector.load %arg3[%c0_1, %c0_2] : memref<16x200xf32, #tpu.memory_space<vmem>>, vector<16x200xf32>
    %cst = arith.constant dense<0.000000e+00> : vector<16x200xf32>
    %3 = tpu.matmul %1, %2, %cst {dimension_numbers = #tpu.dot_dimension_numbers<[1], [0], [0], [1], [0, 0, 1, 1], [], []>} : vector<16x16xf32>, vector<16x200xf32>, vector<16x200xf32> -> vector<16x200xf32>
    %c0_3 = arith.constant 0 : index
    %c0_4 = arith.constant 0 : index
    %4 = vector.load %arg4[%c0_3, %c0_4] : memref<16x200xf32, #tpu.memory_space<vmem>>, vector<16x200xf32>
    tpu.vector_store %arg4[%c0_3, %c0_4], %3 {strides = array<i32>} : memref<16x200xf32, #tpu.memory_space<vmem>>, vector<16x200xf32>,
    return
  }
  func.func @transform_0(%arg0: i32, %arg1: i32) -> (i32, i32) {
    %c0_i32 = arith.constant 0 : i32
    %c0_i32_0 = arith.constant 0 : i32
    return %arg0, %c0_i32 : i32, i32
  }
  func.func @transform_1(%arg0: i32, %arg1: i32) -> (i32, i32) {
    %c0_i32 = arith.constant 0 : i32
    %c0_i32_0 = arith.constant 0 : i32
    return %c0_i32, %arg1 : i32, i32
  }
  func.func @transform_2(%arg0: i32, %arg1: i32) -> (i32, i32) {
    %c0_i32 = arith.constant 0 : i32
    return %arg0, %arg1 : i32, i32
  }
}

module attributes {stable_mosaic.version = 11 : i64} {
  func.func @_tag_embedding_kernel(%arg0: i32, %arg1: i32, %arg2: memref<16x16xi32, #tpu.memory_space<vmem>>, %arg3: memref<16x200xf32, #tpu.memory_space<vmem>>, %arg4: memref<16x200xf32, #tpu.memory_space<vmem>>) attributes {dimension_semantics = [#tpu.dimension_semantics<parallel>, #tpu.dimension_semantics<parallel>], iteration_bounds = array<i64: 1, 1>, scalar_prefetch = 0 : i64, scratch_operands = 0 : i64, tpu.core_type = #tpu.core_type<tc>, window_params = [{transform_indices = @transform_0, window_bounds = array<i64: 16, 16>}, {transform_indices = @transform_1, window_bounds = array<i64: 16, 200>}, {transform_indices = @transform_2, window_bounds = array<i64: 16, 200>}]} {
    %c0 = arith.constant 0 : index
    %c0_0 = arith.constant 0 : index
    %0 = vector.load %arg2[%c0, %c0_0] : memref<16x16xi32, #tpu.memory_space<vmem>>, vector<16x16xi32>
    %1 = arith.sitofp %0 : vector<16x16xi32> to vector<16x16xf32>
    %c0_1 = arith.constant 0 : index
    %c0_2 = arith.constant 0 : index
    %2 = vector.load %arg3[%c0_1, %c0_2] : memref<16x200xf32, #tpu.memory_space<vmem>>, vector<16x200xf32>
    %cst = arith.constant dense<0.000000e+00> : vector<16x200xf32>
    %3 = tpu.matmul %1, %2, %cst {dimension_numbers = #tpu.dot_dimension_numbers<[1], [0], [0], [1], [0, 0, 1, 1], [], []>} : vector<16x16xf32>, vector<16x200xf32>, vector<16x200xf32> -> vector<16x200xf32>
    %c0_3 = arith.constant 0 : index
    %c0_4 = arith.constant 0 : index
    %4 = vector.load %arg4[%c0_3, %c0_4] : memref<16x200xf32, #tpu.memory_space<vmem>>, vector<16x200xf32>
    tpu.vector_store %arg4[%c0_3, %c0_4], %3 {strides = array<i32>} : memref<16x200xf32, #tpu.memory_space<vmem>>, vector<16x200xf32>,
    return
  }
  func.func @transform_0(%arg0: i32, %arg1: i32) -> (i32, i32) {
    %c0_i32 = arith.constant 0 : i32
    %c0_i32_0 = arith.constant 0 : i32
    return %arg0, %c0_i32 : i32, i32
  }
  func.func @transform_1(%arg0: i32, %arg1: i32) -> (i32, i32) {
    %c0_i32 = arith.constant 0 : i32
    %c0_i32_0 = arith.constant 0 : i32
    return %c0_i32, %arg1 : i32, i32
  }
  func.func @transform_2(%arg0: i32, %arg1: i32) -> (i32, i32) {
    %c0_i32 = arith.constant 0 : i32
    return %arg0, %arg1 : i32, i32
  }
}

</mosaic_0001>

<bundles_post_ra>
// kernel: tpu_custom_call.1
= control target key start
LH: loop header
LB: loop body
LE: loop exit
PB: predicated region body
PF: predicated region fallthrough
CT: control target
= control target key end

     0   :  { %7 = vsyncpa [#allocation3], 0  ;;  %s260_s0 = inlined_call_operand.hbm [shape: s32[16,16], index: 0, kind: input, shape index: {}]   ;;  %s261_s1 = inlined_call_operand.hbm [shape: f32[16,200], index: 1, kind: input, shape index: {}]   ;;  %s262_s2 = inlined_call_operand.hbm [shape: f32[16,200], index: 2, kind: output, shape index: {}]  }
   0x1   :  { %8 = vsyncpa [#allocation6], 0 }
   0x2   :  { %9 = vsyncpa [#allocation4], 0  ;;  %s14_s11 = sshll.u32 %s260_s0, 4  ;;  %s223_s12 = smov [#allocation2]   ;;  %s15_s11 = int_to_ptr.hbm [resolvable:$true] %s14_s11 }
   0x3   :  { %s16_s13 = sshll.u32 %s223_s12, 4  ;;  %s27_s16 = sshll.u32 %s261_s1, 4  ;;  %s17_s13 = int_to_ptr.vmem [resolvable:$true] %s16_s13  ;;  %s28_s16 = int_to_ptr.hbm [resolvable:$true] %s27_s16 }
   0x4   :  { %s224_s17 = smov 128   ;;  %s225_s18 = smov 8  }
   0x5   :  { %22 = dma.hbm_to_vmem [thread:$0]  %s15_s11, 256, %s17_s13, [#allocation3], %s224_s17, %s224_s17, %s225_s18  }
   0x6   :  { %s226_s19 = smov [#allocation5]   ;;  %s227_s21 = smov 256  }
   0x7   :  { %s29_s20 = sshll.u32 %s226_s19, 4  ;;  %s228_s22 = smov 16   ;;  %s30_s20 = int_to_ptr.vmem [resolvable:$true] %s29_s20 }
   0x8   :  { %35 = dma.hbm_to_vmem [thread:$0]  %s28_s16, 512, %s30_s20, [#allocation6], %s227_s21, %s227_s21, %s228_s22  }
   0x9   :  { %217 = dma.done.wait [#allocation3], 256  }
   0xa   :  { %218 = vsyncadd [#allocation3], 4294967040 }
   0xb   :  { %219 = dma.done.wait [#allocation6], 512  }
   0xc   :  { %220 = vsyncadd [#allocation6], 4294966784  ;;  %v50_v0 = vld [vmem:[#allocation5 + $0x10] sm:$0xff]  ;;  %v51_v1 = vld [vmem:[#allocation5 + $0x18] sm:$0xff]  ;;  %vm52_vm0 = vcmask 130048   ;;  %vm106_vm1 = vcmask 588800  }
   0xd   :  { %v48_v2 = vld [vmem:[#allocation5] sm:$0xff]  ;;  %134 = vmatpush.msra.mxu2 %v50_v0  ;;  %136 = vmatpush.msra.mxu3 %v51_v1  ;;  %v49_v3 = vld [vmem:[#allocation5 + $0x8] sm:$0xff]  ;;  %v45_v4 = vld [vmem:[#allocation2 + $0x8] sm:$0xff]  ;;  %s229_s0 = smov [#allocation7]   ;;  %s116_s25 = sshll.u32 %s262_s2, 4  ;;  %s117_s25 = int_to_ptr.hbm [resolvable:$true] %s116_s25 }
   0xe   :  { %v44_v5 = vld [vmem:[#allocation2] sm:$0xff]  ;;  %v47_v6 = vcvt.s32.f32 %v45_v4  ;;  %73 = vmatpush.msra.mxu0 %v50_v0  ;;  %96 = vmatpush.msra.mxu1 %v51_v1  ;;  %s114_s1 = sshll.u32 %s229_s0, 4  ;;  %s115_s1 = int_to_ptr.vmem [resolvable:$true] %s114_s1 }
   0xf   :  { %v46_v7 = vcvt.s32.f32 %v44_v5  ;;  %135 = vmatpush.msra.mxu2 %v48_v2  ;;  %137 = vmatpush.msra.mxu3 %v49_v3 }
  0x10   :  { %131 = vmatmul.msk.f32.vlgmr.msra.gmra.mxu2 %vm52_vm0, %v47_v6  ;;  %133 = vmatmul.msk.f32.vlgmr.msra.gmra.mxu3 %vm52_vm0, %v47_v6 }
  0x11   :  { %74 = vmatpush.msra.mxu0 %v48_v2  ;;  %97 = vmatpush.msra.mxu1 %v49_v3 }
  0x12   :  { %130 = vmatmul.msk.f32.vlgmr.msra.gmra.mxu0 %vm52_vm0, %v46_v7  ;;  %132 = vmatmul.msk.f32.vlgmr.msra.gmra.mxu1 %vm52_vm0, %v46_v7 }
  0x8f   :  { %v76_v8 = vpop.f32.mrf.mxu0  ;;  %v99_v9 = vpop.f32.mrf.mxu1 }
  0x90   :  { %105 = vst [vmem:[#allocation7] sm:$0xff] %v76_v8 }
  0x91   :  { %107 = vst.msk [vmem:[#allocation7 + $0x8] sm:$0xff] %vm106_vm1, %v99_v9 }
  0x93   :  { %v79_v10 = vpop.f32.mrf.mxu2  ;;  %v102_v11 = vpop.f32.mrf.mxu3 }
  0x94   :  { %108 = vst [vmem:[#allocation7 + $0x10] sm:$0xff] %v79_v10 }
  0x95   :  { %109 = vst.msk [vmem:[#allocation7 + $0x18] sm:$0xff] %vm106_vm1, %v102_v11 }
  0x96   :  { %122 = dma.vmem_to_hbm [thread:$0]  %s115_s1, 512, %s117_s25, [#allocation4], %s227_s21, %s227_s21, %s228_s22  }
  0x97   :  { %221 = dma.done.wait [#allocation4], 512  }
  0x98   :  { %222 = vsyncadd [#allocation4], 4294966784 }
  0x99   :  { %127 = vsyncpa [#allocation3], 1 }
  0x9a   :  { %128 = vsyncpa [#allocation6], 1 }
  0x9b   :  { %129 = vsyncpa [#allocation4], 1 }

// kernel: tpu_custom_call.1
= control target key start
LH: loop header
LB: loop body
LE: loop exit
PB: predicated region body
PF: predicated region fallthrough
CT: control target
= control target key end

     0   :  { %7 = vsyncpa [#allocation3], 0  ;;  %s260_s0 = inlined_call_operand.hbm [shape: s32[16,16], index: 0, kind: input, shape index: {}]   ;;  %s261_s1 = inlined_call_operand.hbm [shape: f32[16,200], index: 1, kind: input, shape index: {}]   ;;  %s262_s2 = inlined_call_operand.hbm [shape: f32[16,200], index: 2, kind: output, shape index: {}]  }
   0x1   :  { %8 = vsyncpa [#allocation6], 0 }
   0x2   :  { %9 = vsyncpa [#allocation4], 0  ;;  %s14_s11 = sshll.u32 %s260_s0, 4  ;;  %s223_s12 = smov [#allocation2]   ;;  %s15_s11 = int_to_ptr.hbm [resolvable:$true] %s14_s11 }
   0x3   :  { %s16_s13 = sshll.u32 %s223_s12, 4  ;;  %s27_s16 = sshll.u32 %s261_s1, 4  ;;  %s17_s13 = int_to_ptr.vmem [resolvable:$true] %s16_s13  ;;  %s28_s16 = int_to_ptr.hbm [resolvable:$true] %s27_s16 }
   0x4   :  { %s224_s17 = smov 128   ;;  %s225_s18 = smov 8  }
   0x5   :  { %22 = dma.hbm_to_vmem [thread:$0]  %s15_s11, 256, %s17_s13, [#allocation3], %s224_s17, %s224_s17, %s225_s18  }
   0x6   :  { %s226_s19 = smov [#allocation5]   ;;  %s227_s21 = smov 256  }
   0x7   :  { %s29_s20 = sshll.u32 %s226_s19, 4  ;;  %s228_s22 = smov 16   ;;  %s30_s20 = int_to_ptr.vmem [resolvable:$true] %s29_s20 }
   0x8   :  { %35 = dma.hbm_to_vmem [thread:$0]  %s28_s16, 512, %s30_s20, [#allocation6], %s227_s21, %s227_s21, %s228_s22  }
   0x9   :  { %217 = dma.done.wait [#allocation3], 256  }
   0xa   :  { %218 = vsyncadd [#allocation3], 4294967040 }
   0xb   :  { %219 = dma.done.wait [#allocation6], 512  }
   0xc   :  { %220 = vsyncadd [#allocation6], 4294966784  ;;  %v50_v0 = vld [vmem:[#allocation5 + $0x10] sm:$0xff]  ;;  %v51_v1 = vld [vmem:[#allocation5 + $0x18] sm:$0xff]  ;;  %vm52_vm0 = vcmask 130048   ;;  %vm106_vm1 = vcmask 588800  }
   0xd   :  { %v48_v2 = vld [vmem:[#allocation5] sm:$0xff]  ;;  %134 = vmatpush.msra.mxu2 %v50_v0  ;;  %136 = vmatpush.msra.mxu3 %v51_v1  ;;  %v49_v3 = vld [vmem:[#allocation5 + $0x8] sm:$0xff]  ;;  %v45_v4 = vld [vmem:[#allocation2 + $0x8] sm:$0xff]  ;;  %s229_s0 = smov [#allocation7]   ;;  %s116_s25 = sshll.u32 %s262_s2, 4  ;;  %s117_s25 = int_to_ptr.hbm [resolvable:$true] %s116_s25 }
   0xe   :  { %v44_v5 = vld [vmem:[#allocation2] sm:$0xff]  ;;  %v47_v6 = vcvt.s32.f32 %v45_v4  ;;  %73 = vmatpush.msra.mxu0 %v50_v0  ;;  %96 = vmatpush.msra.mxu1 %v51_v1  ;;  %s114_s1 = sshll.u32 %s229_s0, 4  ;;  %s115_s1 = int_to_ptr.vmem [resolvable:$true] %s114_s1 }
   0xf   :  { %v46_v7 = vcvt.s32.f32 %v44_v5  ;;  %135 = vmatpush.msra.mxu2 %v48_v2  ;;  %137 = vmatpush.msra.mxu3 %v49_v3 }
  0x10   :  { %131 = vmatmul.msk.f32.vlgmr.msra.gmra.mxu2 %vm52_vm0, %v47_v6  ;;  %133 = vmatmul.msk.f32.vlgmr.msra.gmra.mxu3 %vm52_vm0, %v47_v6 }
  0x11   :  { %74 = vmatpush.msra.mxu0 %v48_v2  ;;  %97 = vmatpush.msra.mxu1 %v49_v3 }
  0x12   :  { %130 = vmatmul.msk.f32.vlgmr.msra.gmra.mxu0 %vm52_vm0, %v46_v7  ;;  %132 = vmatmul.msk.f32.vlgmr.msra.gmra.mxu1 %vm52_vm0, %v46_v7 }
  0x8f   :  { %v76_v8 = vpop.f32.mrf.mxu0  ;;  %v99_v9 = vpop.f32.mrf.mxu1 }
  0x90   :  { %105 = vst [vmem:[#allocation7] sm:$0xff] %v76_v8 }
  0x91   :  { %107 = vst.msk [vmem:[#allocation7 + $0x8] sm:$0xff] %vm106_vm1, %v99_v9 }
  0x93   :  { %v79_v10 = vpop.f32.mrf.mxu2  ;;  %v102_v11 = vpop.f32.mrf.mxu3 }
  0x94   :  { %108 = vst [vmem:[#allocation7 + $0x10] sm:$0xff] %v79_v10 }
  0x95   :  { %109 = vst.msk [vmem:[#allocation7 + $0x18] sm:$0xff] %vm106_vm1, %v102_v11 }
  0x96   :  { %122 = dma.vmem_to_hbm [thread:$0]  %s115_s1, 512, %s117_s25, [#allocation4], %s227_s21, %s227_s21, %s228_s22  }
  0x97   :  { %221 = dma.done.wait [#allocation4], 512  }
  0x98   :  { %222 = vsyncadd [#allocation4], 4294966784 }
  0x99   :  { %127 = vsyncpa [#allocation3], 1 }
  0x9a   :  { %128 = vsyncpa [#allocation6], 1 }
  0x9b   :  { %129 = vsyncpa [#allocation4], 1 }

</bundles_post_ra>
